<compile_context>
chip_gen: v5e
topology: v5e:2x2
jax: 0.10.0
libtpu: 0.0.40
codegen_flags: <defaults>
</compile_context>

<pallas_src>
import functools

import jax
import jax.numpy as jnp
from jax.experimental import pallas as pl
from jax.experimental.pallas import tpu as pltpu


def _round_up(v, m):
    return (v + m - 1) // m * m


# --------------------------------------------------------------------------
# Prologue kernel: XW_norm = dinv[:, None] * (X @ W), written in bf16.
# --------------------------------------------------------------------------
def _xw_kernel(x_ref, w_ref, d_ref, o_ref):
    xw = jnp.dot(x_ref[...], w_ref[...], preferred_element_type=jnp.float32)
    o_ref[...] = (xw * d_ref[...]).astype(o_ref.dtype)


def _xw_norm(x, w, dinv, *, tr):
    """x: (Np, Cin) bf16, w: (Cin, Cout) bf16, dinv: (Np, 1) f32 -> (Np, Cout) bf16."""
    n_pad, cin = x.shape
    cout = w.shape[1]
    return pl.pallas_call(
        _xw_kernel,
        out_shape=jax.ShapeDtypeStruct((n_pad, cout), jnp.bfloat16),
        grid_spec=pltpu.PrefetchScalarGridSpec(
            num_scalar_prefetch=0,
            grid=(n_pad // tr,),
            in_specs=[
                pl.BlockSpec((tr, cin), lambda i: (i, 0)),      # X rows
                pl.BlockSpec((cin, cout), lambda i: (0, 0)),    # W (resident)
                pl.BlockSpec((tr, 1), lambda i: (i, 0)),        # dinv rows
            ],
            out_specs=pl.BlockSpec((tr, cout), lambda i: (i, 0)),
        ),
        compiler_params=pltpu.CompilerParams(
            dimension_semantics=("parallel",)),
    )(x, w, dinv)


# --------------------------------------------------------------------------
# Main kernel: neighborhood aggregation, tiled over (row block i, k block).
#   out = sigmoid?( dinv_row * (A_int8 @ XW_norm) + b )
# --------------------------------------------------------------------------
def _agg_kernel(a_ref, xw_ref, b_ref, drow_ref, o_ref, acc_ref, *, apply_sigmoid):
    """a_ref   : (tm, tk)   int8  raw adjacency tile (with remaining self loops)
       xw_ref  : (tk, Cout) bf16  dinv-scaled transformed features for this k block
       b_ref   : (1, Cout)  f32   layer bias (resident)
       drow_ref: (tm, 1)    f32   D^-1/2 for the output rows of this i block
       o_ref   : (tm, Cout)       output tile (written at k == last)
       acc_ref : (tm, Cout) f32   VMEM accumulator scratch
    """
    k = pl.program_id(1)

    @pl.when(k == 0)
    def _():
        acc_ref[...] = jnp.zeros_like(acc_ref)

    # int8 -> bf16 upcast on the VPU (hidden under the A-tile DMA), then MXU.
    a_bf = a_ref[...].astype(jnp.bfloat16)
    acc_ref[...] += jnp.dot(a_bf, xw_ref[...], preferred_element_type=jnp.float32)

    @pl.when(k == pl.num_programs(1) - 1)
    def _():
        h = acc_ref[...] * drow_ref[...] + b_ref[...]
        if apply_sigmoid:
            h = jax.nn.sigmoid(h)
        o_ref[...] = h.astype(o_ref.dtype)


def _aggregate(a, xw, b, dinv, *, apply_sigmoid, out_dtype, tm, tk):
    """a: (Np, Np) int8, xw: (Np, Cout) bf16, b: (1, Cout) f32, dinv: (Np, 1) f32."""
    n_pad = a.shape[0]
    cout = xw.shape[1]
    grid = (n_pad // tm, n_pad // tk)
    kernel = functools.partial(_agg_kernel, apply_sigmoid=apply_sigmoid)

    out_bytes = jnp.dtype(out_dtype).itemsize
    cost = pl.CostEstimate(
        flops=int(2 * n_pad * n_pad * cout),
        transcendentals=int(n_pad * cout) if apply_sigmoid else 0,
        bytes_accessed=int(n_pad * n_pad * 1                 # int8 A stream (dominant)
                           + n_pad * cout * 2 * grid[0]      # XW re-stream per row block
                           + n_pad * cout * out_bytes),      # output writeback
    )

    return pl.pallas_call(
        kernel,
        out_shape=jax.ShapeDtypeStruct((n_pad, cout), out_dtype),
        grid_spec=pltpu.PrefetchScalarGridSpec(
            num_scalar_prefetch=0,
            grid=grid,
            in_specs=[
                pl.BlockSpec((tm, tk), lambda i, k: (i, k)),     # A tile (int8, streamed)
                pl.BlockSpec((tk, cout), lambda i, k: (k, 0)),   # XW_norm rows for k block
                pl.BlockSpec((1, cout), lambda i, k: (0, 0)),    # bias (resident)
                pl.BlockSpec((tm, 1), lambda i, k: (i, 0)),      # dinv rows
            ],
            out_specs=pl.BlockSpec((tm, cout), lambda i, k: (i, 0)),
            scratch_shapes=[pltpu.VMEM((tm, cout), jnp.float32)],
        ),
        compiler_params=pltpu.CompilerParams(
            dimension_semantics=("parallel", "arbitrary"),
        ),
        cost_estimate=cost,
    )(a, xw, b, dinv)


# --------------------------------------------------------------------------
# Forward pass
# --------------------------------------------------------------------------
def gcn_forward(x, edge_index, edge_attr, params):
    """x: [N, Cin] f32, edge_index: [2, E] int32 (row=src, col=dst)."""
    del edge_attr  # unused by the reference forward
    n, in_c = x.shape
    w1, b1, w2, b2, w3, b3 = params
    out_c = w3.shape[1]
    hid_c = w1.shape[1]

    # --- tiling / padding policy ---------------------------------------------
    tile = min(1024, _round_up(max(n, 1), 256))   # big tiles: step overhead << DMA
    n_pad = _round_up(n, tile)
    tk = tile
    tm = tile
    if n_pad // tm < 2 and tm >= 512:
        tm = tm // 2          # ensure >= 2 row blocks so v7x's two TCs both get work
    cin_p = _round_up(in_c, 128)                  # lane-dense channel dims
    chid_p = _round_up(hid_c, 128)
    cout_p = _round_up(out_c, 128)

    # --- adjacency at storage dtype (int8) + add_remaining_self_loops --------
    src, dst = edge_index[0], edge_index[1]
    e = src.shape[0]
    a = jnp.zeros((n_pad, n_pad), jnp.int8).at[dst, src].add(
        jnp.ones((e,), jnp.int8))
    idx = jnp.arange(n)
    # PyG gcn_norm: add self loops only where missing (no double-count).
    a = a.at[idx, idx].set(jnp.maximum(a[idx, idx], jnp.int8(1)))

    # --- degrees computed O(E) from the edge list (no dense row-sum) ---------
    in_deg = jnp.zeros((n_pad,), jnp.float32).at[dst].add(jnp.ones((e,), jnp.float32))
    self_cnt = jnp.zeros((n_pad,), jnp.float32).at[dst].add(
        jnp.where(src == dst, 1.0, 0.0))
    node_mask = jnp.arange(n_pad) < n
    deg = jnp.where(node_mask, in_deg + jnp.where(self_cnt > 0, 0.0, 1.0), 0.0)
    dinv = jnp.where(deg > 0, jax.lax.rsqrt(deg), 0.0).reshape(n_pad, 1)
    dinv = dinv.astype(jnp.float32)

    # --- pad operands to lane-dense shapes ------------------------------------
    def pad2(m, r, c, dtype):
        return jnp.zeros((r, c), dtype).at[:m.shape[0], :m.shape[1]].set(m.astype(dtype))

    x_p = pad2(x, n_pad, cin_p, jnp.bfloat16)
    w1_p = pad2(w1, cin_p, chid_p, jnp.bfloat16)
    w2_p = pad2(w2, chid_p, chid_p, jnp.bfloat16)
    w3_p = pad2(w3, chid_p, cout_p, jnp.bfloat16)
    b1_p = pad2(b1.reshape(1, -1), 1, chid_p, jnp.float32)
    b2_p = pad2(b2.reshape(1, -1), 1, chid_p, jnp.float32)
    b3_p = pad2(b3.reshape(1, -1), 1, cout_p, jnp.float32)

    # --- three GCN layers: prologue (XW_norm) + tiled aggregation -------------
    xw = _xw_norm(x_p, w1_p, dinv, tr=tm)
    h = _aggregate(a, xw, b1_p, dinv, apply_sigmoid=True,
                   out_dtype=jnp.bfloat16, tm=tm, tk=tk)
    xw = _xw_norm(h, w2_p, dinv, tr=tm)
    h = _aggregate(a, xw, b2_p, dinv, apply_sigmoid=True,
                   out_dtype=jnp.bfloat16, tm=tm, tk=tk)
    xw = _xw_norm(h, w3_p, dinv, tr=tm)
    h = _aggregate(a, xw, b3_p, dinv, apply_sigmoid=False,
                   out_dtype=jnp.float32, tm=tm, tk=tk)

    return h[:n, :out_c]


def init_params(key, in_channels, hidden_channels, out_channels):
    """Deterministic Glorot-uniform weights, zero biases (PyG GCNConv default)."""
    def glorot(k, fan_in, fan_out):
        limit = (6.0 / (fan_in + fan_out)) ** 0.5
        return jax.random.uniform(k, (fan_in, fan_out), jnp.float32, -limit, limit)

    k1, k2, k3 = jax.random.split(key, 3)
    w1 = glorot(k1, in_channels, hidden_channels)
    w2 = glorot(k2, hidden_channels, hidden_channels)
    w3 = glorot(k3, hidden_channels, out_channels)
    b1 = jnp.zeros((1, hidden_channels), jnp.float32)
    b2 = jnp.zeros((1, hidden_channels), jnp.float32)
    b3 = jnp.zeros((1, out_channels), jnp.float32)
    return (w1, b1, w2, b2, w3, b3)


if __name__ == "__main__":
    key = jax.random.PRNGKey(0)
    N, E = 16, 40
    IN_C, HID_C, OUT_C = 8, 32, 4

    kx, ke, kp = jax.random.split(key, 3)
    x = jax.random.normal(kx, (N, IN_C), jnp.float32)
    edge_index = jax.random.randint(ke, (2, E), 0, N, jnp.int32)
    edge_attr = jnp.ones((E, 1), jnp.float32)  # unused, matches reference signature

    params = init_params(kp, IN_C, HID_C, OUT_C)

    out = gcn_forward(x, edge_index, edge_attr, params)
    out = jax.block_until_ready(out)
    assert out.shape == (N, OUT_C)
    assert bool(jnp.all(jnp.isfinite(out)))
    print("KERNEL_OK")
</pallas_src>

<mosaic_0001>
module attributes {stable_mosaic.version = 11 : i64} {
  func.func @_xw_kernel(%arg0: i32, %arg1: memref<256x128xbf16, #tpu.memory_space<vmem>>, %arg2: memref<128x128xbf16, #tpu.memory_space<vmem>>, %arg3: memref<256x1xf32, #tpu.memory_space<vmem>>, %arg4: memref<256x128xbf16, #tpu.memory_space<vmem>>) attributes {dimension_semantics = [#tpu.dimension_semantics<parallel>], iteration_bounds = array<i64: 1>, scalar_prefetch = 0 : i64, scratch_operands = 0 : i64, tpu.core_type = #tpu.core_type<tc>, window_params = [{transform_indices = @transform_0, window_bounds = array<i64: 256, 128>}, {pipeline_mode = #tpu.pipeline_mode<synchronous>, transform_indices = @transform_1, window_bounds = array<i64: 128, 128>}, {transform_indices = @transform_2, window_bounds = array<i64: 256, 1>}, {transform_indices = @transform_3, window_bounds = array<i64: 256, 128>}]} {
    %c0 = arith.constant 0 : index
    %c0_0 = arith.constant 0 : index
    %0 = vector.load %arg1[%c0, %c0_0] : memref<256x128xbf16, #tpu.memory_space<vmem>>, vector<256x128xbf16>
    %c0_1 = arith.constant 0 : index
    %c0_2 = arith.constant 0 : index
    %1 = vector.load %arg2[%c0_1, %c0_2] : memref<128x128xbf16, #tpu.memory_space<vmem>>, vector<128x128xbf16>
    %cst = arith.constant dense<0.000000e+00> : vector<256x128xf32>
    %2 = tpu.matmul %0, %1, %cst {dimension_numbers = #tpu.dot_dimension_numbers<[1], [0], [0], [1], [0, 0, 1, 1], [], []>} : vector<256x128xbf16>, vector<128x128xbf16>, vector<256x128xf32> -> vector<256x128xf32>
    %c0_3 = arith.constant 0 : index
    %c0_4 = arith.constant 0 : index
    %3 = vector.load %arg3[%c0_3, %c0_4] : memref<256x1xf32, #tpu.memory_space<vmem>>, vector<256x1xf32>
    %4 = vector.broadcast %3 : vector<256x1xf32> to vector<256x128xf32>
    %5 = arith.mulf %2, %4 : vector<256x128xf32>
    %6 = arith.truncf %5 : vector<256x128xf32> to vector<256x128xbf16>
    %c0_5 = arith.constant 0 : index
    %c0_6 = arith.constant 0 : index
    %7 = vector.load %arg4[%c0_5, %c0_6] : memref<256x128xbf16, #tpu.memory_space<vmem>>, vector<256x128xbf16>
    tpu.vector_store %arg4[%c0_5, %c0_6], %6 {strides = array<i32>} : memref<256x128xbf16, #tpu.memory_space<vmem>>, vector<256x128xbf16>,
    return
  }
  func.func @transform_0(%arg0: i32) -> (i32, i32) {
    %c0_i32 = arith.constant 0 : i32
    %c0_i32_0 = arith.constant 0 : i32
    return %arg0, %c0_i32 : i32, i32
  }
  func.func @transform_1(%arg0: i32) -> (i32, i32) {
    %c0_i32 = arith.constant 0 : i32
    %c0_i32_0 = arith.constant 0 : i32
    %c0_i32_1 = arith.constant 0 : i32
    return %c0_i32, %c0_i32_0 : i32, i32
  }
  func.func @transform_2(%arg0: i32) -> (i32, i32) {
    %c0_i32 = arith.constant 0 : i32
    %c0_i32_0 = arith.constant 0 : i32
    return %arg0, %c0_i32 : i32, i32
  }
  func.func @transform_3(%arg0: i32) -> (i32, i32) {
    %c0_i32 = arith.constant 0 : i32
    %c0_i32_0 = arith.constant 0 : i32
    return %arg0, %c0_i32 : i32, i32
  }
}

</mosaic_0001>

<bundles_post_ra>
// kernel: tpu_custom_call.1
= control target key start
LH: loop header
LB: loop body
LE: loop exit
PB: predicated region body
PF: predicated region fallthrough
CT: control target
= control target key end

     0   :  { %v874_v3 = vmov 0   ;;  %s1102_s0 = inlined_call_operand.vmem [shape: bf16[256,128], index: 0, kind: input, shape index: {}]   ;;  %s1103_s1 = inlined_call_operand.vmem [shape: bf16[128,128], index: 1, kind: input, shape index: {}]   ;;  %s1104_s2 = inlined_call_operand.vmem [shape: f32[256,1], index: 2, kind: input, shape index: {}]   ;;  %s1105_s3 = inlined_call_operand.hbm [shape: bf16[256,128], index: 3, kind: output, shape index: {}]  }
   0x1   :  { %v300_v0 = vld [vmem:[%s1104_s2 + $0x20] sm:$0xff]  ;;  %v298_v1 = vld [vmem:[%s1104_s2 + $0x10] sm:$0xff]  ;;  %847 = vset.pattern.permute.xlu2 %v874_v3  ;;  %846 = vset.pattern.permute.xlu1 %v874_v3  ;;  %v721_v4 = vld [vmem:[%s1103_s1 + $0x38] sm:$0xff] }
   0x2   :  { %v296_v2 = vld [vmem:[%s1104_s2] sm:$0xff]  ;;  %845 = vset.pattern.permute.xlu0 %v874_v3  ;;  %350 = vperm.xlu2 %847, %v300_v0   ;;  %v720_v5 = vld [vmem:[%s1103_s1 + $0x30] sm:$0xff]  ;;  %v301_v6 = vld [vmem:[%s1104_s2 + $0x28] sm:$0xff] }
   0x3   :  { %340 = vperm.xlu1 %846, %v298_v1   ;;  %330 = vperm.xlu0 %845, %v296_v2   ;;  %v299_v7 = vld [vmem:[%s1104_s2 + $0x18] sm:$0xff]  ;;  %v297_v8 = vld [vmem:[%s1104_s2 + $0x8] sm:$0xff] }
   0x4   :  { %207 = vmatpush.bf16.msra.mxu0 %v721_v4  ;;  %817 = vmatpush.bf16.msra.mxu1 %v721_v4  ;;  %v719_v9 = vld [vmem:[%s1103_s1 + $0x28] sm:$0xff] }
   0x5   :  { %818 = vmatpush.bf16.msra.mxu2 %v721_v4  ;;  %819 = vmatpush.bf16.msra.mxu3 %v721_v4 }
   0x8   :  { %208 = vmatpush.bf16.msra.mxu0 %v720_v5  ;;  %820 = vmatpush.bf16.msra.mxu1 %v720_v5 }
   0x9   :  { %821 = vmatpush.bf16.msra.mxu2 %v720_v5  ;;  %822 = vmatpush.bf16.msra.mxu3 %v720_v5 }
   0xa   :  { %8 = vsyncpa [#allocation3], 0  ;;  %355 = vperm.xlu2 %847, %v301_v6   ;;  %v718_v10 = vld [vmem:[%s1103_s1 + $0x20] sm:$0xff]  ;;  %v303_v12 = vld [vmem:[%s1104_s2 + $0x38] sm:$0xff]  ;;  %s590_s15 = sshll.u32 %s1105_s3, 4  ;;  %s876_s16 = smov 64   ;;  %s591_s15 = int_to_ptr.hbm [resolvable:$true] %s590_s15 }
   0xb   :  { %345 = vperm.xlu1 %846, %v299_v7   ;;  %335 = vperm.xlu0 %845, %v297_v8   ;;  %v304_v11 = vld [vmem:[%s1104_s2 + $0x40] sm:$0xff]  ;;  %v302_v13 = vld [vmem:[%s1104_s2 + $0x30] sm:$0xff]  ;;  %v717_v14 = vld [vmem:[%s1103_s1 + $0x18] sm:$0xff]  ;;  %s877_s17 = smov 4  }
   0xc   :  { %209 = vmatpush.bf16.msra.mxu0 %v719_v9  ;;  %823 = vmatpush.bf16.msra.mxu1 %v719_v9  ;;  %v716_v15 = vld [vmem:[%s1103_s1 + $0x10] sm:$0xff]  ;;  %v307_v16 = vld [vmem:[%s1104_s2 + $0x58] sm:$0xff]  ;;  %v305_v18 = vld [vmem:[%s1104_s2 + $0x48] sm:$0xff] }
   0xd   :  { %824 = vmatpush.bf16.msra.mxu2 %v719_v9  ;;  %825 = vmatpush.bf16.msra.mxu3 %v719_v9  ;;  %v306_v17 = vld [vmem:[%s1104_s2 + $0x50] sm:$0xff]  ;;  %v715_v19 = vld [vmem:[%s1103_s1 + $0x8] sm:$0xff]  ;;  %v714_v20 = vld [vmem:[%s1103_s1] sm:$0xff] }
   0xe   :  { %v310_v21 = vld [vmem:[%s1104_s2 + $0x70] sm:$0xff]  ;;  %v309_v22 = vld [vmem:[%s1104_s2 + $0x68] sm:$0xff]  ;;  %v308_v23 = vld [vmem:[%s1104_s2 + $0x60] sm:$0xff] }
   0xf   :  { %v698_v24 = vld [vmem:[%s1102_s0] sm:$0xff]  ;;  %v313_v28 = vld [vmem:[%s1104_s2 + $0x88] sm:$0xff]  ;;  %v311_v30 = vld [vmem:[%s1104_s2 + $0x78] sm:$0xff] }
  0x10   :  { %210 = vmatpush.bf16.msra.mxu0 %v718_v10  ;;  %826 = vmatpush.bf16.msra.mxu1 %v718_v10  ;;  %v702_v25 = vld [vmem:[%s1102_s0 + $0x20] sm:$0xff]  ;;  %v315_v32 = vld [vmem:[%s1104_s2 + $0x98] sm:$0xff]  ;;  %v314_v33 = vld [vmem:[%s1104_s2 + $0x90] sm:$0xff] }
  0x11   :  { %827 = vmatpush.bf16.msra.mxu2 %v718_v10  ;;  %828 = vmatpush.bf16.msra.mxu3 %v718_v10  ;;  %v706_v26 = vld [vmem:[%s1102_s0 + $0x40] sm:$0xff]  ;;  %v699_v34 = vld [vmem:[%s1102_s0 + $0x8] sm:$0xff]  ;;  %v319_v38 = vld [vmem:[%s1104_s2 + $0xb8] sm:$0xff] }
  0x12   :  { %370 = vperm.xlu2 %847, %v304_v11   ;;  %v710_v27 = vld [vmem:[%s1102_s0 + $0x60] sm:$0xff]  ;;  %v703_v35 = vld [vmem:[%s1102_s0 + $0x28] sm:$0xff]  ;;  %v318_v39 = vld [vmem:[%s1104_s2 + $0xb0] sm:$0xff] }
  0x13   :  { %365 = vperm.xlu1 %846, %v303_v12   ;;  %360 = vperm.xlu0 %845, %v302_v13   ;;  %v312_v29 = vld [vmem:[%s1104_s2 + $0x80] sm:$0xff]  ;;  %v707_v36 = vld [vmem:[%s1102_s0 + $0x48] sm:$0xff]  ;;  %v322_v41 = vld [vmem:[%s1104_s2 + $0xd0] sm:$0xff] }
  0x14   :  { %211 = vmatpush.bf16.msra.mxu0 %v717_v14  ;;  %829 = vmatpush.bf16.msra.mxu1 %v717_v14  ;;  %v316_v31 = vld [vmem:[%s1104_s2 + $0xa0] sm:$0xff]  ;;  %v711_v37 = vld [vmem:[%s1102_s0 + $0x68] sm:$0xff]  ;;  %v700_v44 = vld [vmem:[%s1102_s0 + $0x10] sm:$0xff] }
  0x15   :  { %830 = vmatpush.bf16.msra.mxu2 %v717_v14  ;;  %831 = vmatpush.bf16.msra.mxu3 %v717_v14  ;;  %v317_v40 = vld [vmem:[%s1104_s2 + $0xa8] sm:$0xff]  ;;  %v320_v43 = vld [vmem:[%s1104_s2 + $0xc0] sm:$0xff]  ;;  %v704_v45 = vld [vmem:[%s1102_s0 + $0x30] sm:$0xff] }
  0x16   :  { %v321_v42 = vld [vmem:[%s1104_s2 + $0xc8] sm:$0xff]  ;;  %v708_v46 = vld [vmem:[%s1102_s0 + $0x50] sm:$0xff]  ;;  %v324_v49 = vld [vmem:[%s1104_s2 + $0xe0] sm:$0xff] }
  0x17   :  { %v712_v47 = vld [vmem:[%s1102_s0 + $0x70] sm:$0xff]  ;;  %v325_v48 = vld [vmem:[%s1104_s2 + $0xe8] sm:$0xff]  ;;  %v323_v50 = vld [vmem:[%s1104_s2 + $0xd8] sm:$0xff] }
  0x18   :  { %212 = vmatpush.bf16.msra.mxu0 %v716_v15  ;;  %832 = vmatpush.bf16.msra.mxu1 %v716_v15  ;;  %v327_v51 = vld [vmem:[%s1104_s2 + $0xf8] sm:$0xff]  ;;  %v326_v52 = vld [vmem:[%s1104_s2 + $0xf0] sm:$0xff] }
  0x19   :  { %833 = vmatpush.bf16.msra.mxu2 %v716_v15  ;;  %834 = vmatpush.bf16.msra.mxu3 %v716_v15  ;;  %v701_v53 = vld [vmem:[%s1102_s0 + $0x18] sm:$0xff] }
  0x1a   :  { %385 = vperm.xlu2 %847, %v307_v16   ;;  %v705_v54 = vld [vmem:[%s1102_s0 + $0x38] sm:$0xff] }
  0x1b   :  { %380 = vperm.xlu1 %846, %v306_v17   ;;  %375 = vperm.xlu0 %845, %v305_v18   ;;  %v709_v55 = vld [vmem:[%s1102_s0 + $0x58] sm:$0xff] }
  0x1c   :  { %213 = vmatpush.bf16.msra.mxu0 %v715_v19  ;;  %835 = vmatpush.bf16.msra.mxu1 %v715_v19  ;;  %v713_v56 = vld [vmem:[%s1102_s0 + $0x78] sm:$0xff]  ;;  %s875_s0 = smov [#allocation2]  }
  0x1d   :  { %836 = vmatpush.bf16.msra.mxu2 %v715_v19  ;;  %837 = vmatpush.bf16.msra.mxu3 %v715_v19  ;;  %s588_s2 = sshll.u32 %s875_s0, 4  ;;  %s589_s2 = int_to_ptr.vmem [resolvable:$true] %s588_s2 }
  0x20   :  { %214 = vmatpush.bf16.msra.mxu0 %v714_v20  ;;  %838 = vmatpush.bf16.msra.mxu1 %v714_v20 }
  0x21   :  { %839 = vmatpush.bf16.msra.mxu2 %v714_v20  ;;  %840 = vmatpush.bf16.msra.mxu3 %v714_v20 }
  0x22   :  { %400 = vperm.xlu2 %847, %v310_v21  }
  0x23   :  { %395 = vperm.xlu1 %846, %v309_v22   ;;  %390 = vperm.xlu0 %845, %v308_v23  }
  0x24   :  { %215 = vmatmul.bf16.vlgmr.msra.gmra.mxu0 %v698_v24  ;;  %235 = vmatmul.bf16.vlgmr.msra.gmra.mxu1 %v702_v25 }
  0x25   :  { %255 = vmatmul.bf16.vlgmr.msra.gmra.mxu2 %v706_v26  ;;  %275 = vmatmul.bf16.vlgmr.msra.gmra.mxu3 %v710_v27 }
  0x2a   :  { %415 = vperm.xlu2 %847, %v313_v28  }
  0x2b   :  { %410 = vperm.xlu1 %846, %v312_v29   ;;  %405 = vperm.xlu0 %845, %v311_v30  }
  0x32   :  { %430 = vperm.xlu2 %847, %v316_v31  }
  0x33   :  { %425 = vperm.xlu1 %846, %v315_v32   ;;  %420 = vperm.xlu0 %845, %v314_v33  }
  0x34   :  { %220 = vmatmul.bf16.gmra.mxu0 %v699_v34  ;;  %240 = vmatmul.bf16.gmra.mxu1 %v703_v35 }
  0x35   :  { %260 = vmatmul.bf16.gmra.mxu2 %v707_v36  ;;  %280 = vmatmul.bf16.gmra.mxu3 %v711_v37 }
  0x3a   :  { %445 = vperm.xlu2 %847, %v319_v38  }
  0x3b   :  { %440 = vperm.xlu1 %846, %v318_v39   ;;  %435 = vperm.xlu0 %845, %v317_v40  }
  0x42   :  { %460 = vperm.xlu2 %847, %v322_v41  }
  0x43   :  { %455 = vperm.xlu1 %846, %v321_v42   ;;  %450 = vperm.xlu0 %845, %v320_v43  }
  0x44   :  { %225 = vmatmul.bf16.gmra.mxu0 %v700_v44  ;;  %245 = vmatmul.bf16.gmra.mxu1 %v704_v45 }
  0x45   :  { %265 = vmatmul.bf16.gmra.mxu2 %v708_v46  ;;  %285 = vmatmul.bf16.gmra.mxu3 %v712_v47 }
  0x4a   :  { %475 = vperm.xlu2 %847, %v325_v48  }
  0x4b   :  { %470 = vperm.xlu1 %846, %v324_v49   ;;  %465 = vperm.xlu0 %845, %v323_v50  }
  0x53   :  { %485 = vperm.xlu1 %846, %v327_v51   ;;  %480 = vperm.xlu0 %845, %v326_v52  }
  0x54   :  { %230 = vmatmul.bf16.gmra.mxu0 %v701_v53  ;;  %250 = vmatmul.bf16.gmra.mxu1 %v705_v54 }
  0x55   :  { %270 = vmatmul.bf16.gmra.mxu2 %v709_v55  ;;  %290 = vmatmul.bf16.gmra.mxu3 %v713_v56 }
  0x5c   :  { %v1066_v57 = vpop.permute.xlu2 %350 }
  0x64   :  { %v1068_v60 = vpop.permute.xlu2 %355 }
  0x6c   :  { %v371_v63 = vpop.permute.xlu2 %370 }
  0x74   :  { %v386_v2 = vpop.permute.xlu2 %385 }
  0x75   :  { %v341_v58 = vpop.permute.xlu1 %340  ;;  %v331_v59 = vpop.permute.xlu0 %330 }
  0x7c   :  { %v1078_v7 = vpop.permute.xlu2 %400 }
  0x7d   :  { %v346_v61 = vpop.permute.xlu1 %345  ;;  %v336_v62 = vpop.permute.xlu0 %335 }
  0x84   :  { %v416_v10 = vpop.permute.xlu2 %415 }
  0x85   :  { %v1070_v0 = vpop.permute.xlu1 %365  ;;  %v1072_v1 = vpop.permute.xlu0 %360 }
  0x8c   :  { %v1082_v19 = vpop.permute.xlu2 %430 }
  0x8d   :  { %v381_v3 = vpop.permute.xlu1 %380  ;;  %v376_v4 = vpop.permute.xlu0 %375 }
  0x94   :  { %v1086_v35 = vpop.permute.xlu2 %445 }
  0x95   :  { %v1074_v5 = vpop.permute.xlu1 %395  ;;  %v1076_v6 = vpop.permute.xlu0 %390 }
  0x9c   :  { %v461_v52 = vpop.permute.xlu2 %460 }
  0x9d   :  { %v411_v8 = vpop.permute.xlu1 %410  ;;  %v1080_v9 = vpop.permute.xlu0 %405 }
  0xa1   :  { %v216_v11 = vpop.f32.mrf.mxu0  ;;  %v236_v12 = vpop.f32.mrf.mxu1 }
  0xa2   :  { %v488_v20 = vmul.f32 %v331_v59, %v216_v11  ;;  %v496_v21 = vmul.f32 %v371_v63, %v236_v12 }
  0xa5   :  { %v426_v13 = vpop.permute.xlu1 %425  ;;  %v421_v14 = vpop.permute.xlu0 %420 }
  0xa8   :  { %v256_v15 = vpop.f32.mrf.mxu2  ;;  %v276_v16 = vpop.f32.mrf.mxu3 }
  0xa9   :  { %v218_v17 = vpop.f32.mrf.mxu0  ;;  %v238_v18 = vpop.f32.mrf.mxu1  ;;  %v504_v30 = vmul.f32 %v411_v8, %v256_v15 }
  0xaa   :  { %v489_v22 = vmul.f32 %v336_v62, %v218_v17  ;;  %v497_v23 = vmul.f32 %v376_v4, %v238_v18  ;;  %v476_v17 = vpop.permute.xlu2 %475 }
  0xac   :  { %v725_v24 = vpack.c.bf16 %v489_v22, %v488_v20  ;;  %v745_v25 = vpack.c.bf16 %v497_v23, %v496_v21 }
  0xad   :  { %v1084_v26 = vpop.permute.xlu1 %440  ;;  %v436_v27 = vpop.permute.xlu0 %435 }
  0xae   :  { %726 = vst [vmem:[#allocation2] sm:$0xff] %v725_v24  }
  0xaf   :  { %805 = vst [vmem:[#allocation2 + $0x20] sm:$0xff] %v745_v25  }
  0xb0   :  { %v258_v28 = vpop.f32.mrf.mxu2  ;;  %v278_v29 = vpop.f32.mrf.mxu3 }
  0xb1   :  { %v505_v31 = vmul.f32 %v416_v10, %v258_v28  ;;  %v221_v32 = vpop.f32.mrf.mxu0  ;;  %v241_v33 = vpop.f32.mrf.mxu1 }
  0xb2   :  { %v490_v45 = vmul.f32 %v341_v58, %v221_v32  ;;  %v498_v46 = vmul.f32 %v381_v3, %v241_v33 }
  0xb3   :  { %v765_v34 = vpack.c.bf16 %v505_v31, %v504_v30 }
  0xb5   :  { %809 = vst [vmem:[#allocation2 + $0x40] sm:$0xff] %v765_v34   ;;  %v456_v36 = vpop.permute.xlu1 %455  ;;  %v451_v37 = vpop.permute.xlu0 %450 }
  0xb6   :  { %v513_v38 = vmul.f32 %v456_v36, %v278_v29  ;;  %v512_v39 = vmul.f32 %v451_v37, %v276_v16 }
  0xb8   :  { %v785_v40 = vpack.c.bf16 %v513_v38, %v512_v39  ;;  %v261_v41 = vpop.f32.mrf.mxu2  ;;  %v281_v42 = vpop.f32.mrf.mxu3 }
  0xb9   :  { %v223_v43 = vpop.f32.mrf.mxu0  ;;  %v243_v44 = vpop.f32.mrf.mxu1  ;;  %v506_v55 = vmul.f32 %v421_v14, %v261_v41  ;;  %v514_v56 = vmul.f32 %v461_v52, %v281_v42 }
  0xba   :  { %813 = vst [vmem:[#allocation2 + $0x60] sm:$0xff] %v785_v40   ;;  %v491_v47 = vmul.f32 %v346_v61, %v223_v43  ;;  %v499_v48 = vmul.f32 %v386_v2, %v243_v44 }
  0xbc   :  { %v730_v49 = vpack.c.bf16 %v491_v47, %v490_v45  ;;  %v750_v50 = vpack.c.bf16 %v499_v48, %v498_v46 }
  0xbd   :  { %v466_v51 = vpop.permute.xlu0 %465  ;;  %v471_v18 = vpop.permute.xlu1 %470 }
  0xbe   :  { %802 = vst [vmem:[#allocation2 + $0x8] sm:$0xff] %v730_v49  }
  0xbf   :  { %806 = vst [vmem:[#allocation2 + $0x28] sm:$0xff] %v750_v50  }
  0xc0   :  { %v263_v53 = vpop.f32.mrf.mxu2  ;;  %v283_v54 = vpop.f32.mrf.mxu3 }
  0xc1   :  { %v507_v59 = vmul.f32 %v426_v13, %v263_v53  ;;  %v515_v62 = vmul.f32 %v466_v51, %v283_v54  ;;  %v226_v63 = vpop.f32.mrf.mxu0  ;;  %v246_v4 = vpop.f32.mrf.mxu1 }
  0xc2   :  { %v492_v11 = vmul.f32 %v1066_v57, %v226_v63  ;;  %v500_v12 = vmul.f32 %v1076_v6, %v246_v4 }
  0xc3   :  { %v770_v8 = vpack.c.bf16 %v507_v59, %v506_v55  ;;  %v790_v58 = vpack.c.bf16 %v515_v62, %v514_v56 }
  0xc5   :  { %810 = vst [vmem:[#allocation2 + $0x48] sm:$0xff] %v770_v8   ;;  %v486_v37 = vpop.permute.xlu1 %485  ;;  %v481_v38 = vpop.permute.xlu0 %480 }
  0xc6   :  { %814 = vst [vmem:[#allocation2 + $0x68] sm:$0xff] %v790_v58  }
  0xc8   :  { %v266_v61 = vpop.f32.mrf.mxu2  ;;  %v286_v2 = vpop.f32.mrf.mxu3 }
  0xc9   :  { %v228_v3 = vpop.f32.mrf.mxu0  ;;  %v248_v10 = vpop.f32.mrf.mxu1  ;;  %v508_v22 = vmul.f32 %v1082_v19, %v266_v61  ;;  %v516_v23 = vmul.f32 %v471_v18, %v286_v2 }
  0xca   :  { %v493_v15 = vmul.f32 %v1068_v60, %v228_v3  ;;  %v501_v14 = vmul.f32 %v1074_v5, %v248_v10 }
  0xcc   :  { %v735_v13 = vpack.c.bf16 %v493_v15, %v492_v11  ;;  %v755_v16 = vpack.c.bf16 %v501_v14, %v500_v12 }
  0xce   :  { %803 = vst [vmem:[#allocation2 + $0x10] sm:$0xff] %v735_v13  }
  0xcf   :  { %807 = vst [vmem:[#allocation2 + $0x30] sm:$0xff] %v755_v16  }
  0xd0   :  { %v268_v20 = vpop.f32.mrf.mxu2  ;;  %v288_v21 = vpop.f32.mrf.mxu3 }
  0xd1   :  { %v509_v24 = vmul.f32 %v436_v27, %v268_v20  ;;  %v517_v25 = vmul.f32 %v476_v17, %v288_v21  ;;  %v231_v57 = vpop.f32.mrf.mxu0  ;;  %v251_v28 = vpop.f32.mrf.mxu1 }
  0xd2   :  { %v494_v32 = vmul.f32 %v1072_v1, %v231_v57  ;;  %v502_v33 = vmul.f32 %v1078_v7, %v251_v28 }
  0xd3   :  { %v775_v6 = vpack.c.bf16 %v509_v24, %v508_v22  ;;  %v795_v29 = vpack.c.bf16 %v517_v25, %v516_v23 }
  0xd5   :  { %811 = vst [vmem:[#allocation2 + $0x50] sm:$0xff] %v775_v6  }
  0xd6   :  { %815 = vst [vmem:[#allocation2 + $0x70] sm:$0xff] %v795_v29  }
  0xd8   :  { %v271_v60 = vpop.f32.mrf.mxu2  ;;  %v291_v5 = vpop.f32.mrf.mxu3 }
  0xd9   :  { %v233_v30 = vpop.f32.mrf.mxu0  ;;  %v253_v31 = vpop.f32.mrf.mxu1  ;;  %v510_v1 = vmul.f32 %v1084_v26, %v271_v60  ;;  %v518_v7 = vmul.f32 %v481_v38, %v291_v5 }
  0xda   :  { %v495_v34 = vmul.f32 %v1070_v0, %v233_v30  ;;  %v503_v19 = vmul.f32 %v1080_v9, %v253_v31 }
  0xdc   :  { %v740_v27 = vpack.c.bf16 %v495_v34, %v494_v32  ;;  %v760_v36 = vpack.c.bf16 %v503_v19, %v502_v33 }
  0xde   :  { %804 = vst [vmem:[#allocation2 + $0x18] sm:$0xff] %v740_v27  }
  0xdf   :  { %808 = vst [vmem:[#allocation2 + $0x38] sm:$0xff] %v760_v36  }
  0xe0   :  { %v273_v39 = vpop.f32.mrf.mxu2  ;;  %v293_v40 = vpop.f32.mrf.mxu3 }
  0xe1   :  { %v511_v0 = vmul.f32 %v1086_v35, %v273_v39  ;;  %v519_v9 = vmul.f32 %v486_v37, %v293_v40 }
  0xe3   :  { %v780_v41 = vpack.c.bf16 %v511_v0, %v510_v1  ;;  %v800_v42 = vpack.c.bf16 %v519_v9, %v518_v7 }
  0xe5   :  { %812 = vst [vmem:[#allocation2 + $0x58] sm:$0xff] %v780_v41  }
  0xe6   :  { %816 = vst [vmem:[#allocation2 + $0x78] sm:$0xff] %v800_v42  }
  0xe7   :  { %596 = dma.vmem_to_hbm [thread:$0]  %s589_s2, 2048, %s591_s15, [#allocation3], %s876_s16, %s876_s16, %s877_s17  }
  0xe8   :  { %872 = dma.done.wait [#allocation3], 2048  }
  0xe9   :  { %873 = vsyncadd [#allocation3], 4294965248 }
  0xea   :  { %601 = vsyncpa [#allocation3], 1 }

</bundles_post_ra>
